<compile_context>
chip_gen: v7x
topology: tpu7x:2x2x1
jax: 0.10.0
libtpu: 0.0.40
codegen_flags: <defaults>
</compile_context>

<pallas_src>
import functools

import jax
import jax.numpy as jnp
from jax.experimental import pallas as pl
from jax.experimental.pallas import tpu as pltpu


def _round_up(x, m):
    return ((x + m - 1) // m) * m


def _grayscale_mse_kernel(x_ref, y_ref, o_ref, *, ts, rows_valid, need_mask):
    """One grid step: accumulate sum_{rows,lanes} (sum_c (x - y))^2 for one image tile.

    x_ref, y_ref : (C, ts, 128) VMEM tiles of one image's spatial block.
    o_ref        : (8, 128) f32 partial-sum block, resident across the spatial
                   ("arbitrary") grid axis for this batch index.
    """
    s = pl.program_id(1)

    @pl.when(s == 0)
    def _():
        o_ref[...] = jnp.zeros_like(o_ref)

    x = x_ref[...].astype(jnp.float32)
    y = y_ref[...].astype(jnp.float32)

    # Channel SUM (== C * channel mean); the 1/C^2 is folded into the final scale.
    d = jnp.sum(x - y, axis=0)                              # (ts, 128), VPU adds

    if need_mask:
        # Ragged last spatial block: rows past the array end hold undefined VMEM
        # contents -> zero them out before they enter the sum.
        row = s * ts + jax.lax.broadcasted_iota(jnp.int32, (ts, 128), 0)
        d = jnp.where(row < rows_valid, d, 0.0)

    sq = d * d
    # Fold the ts rows onto 8 sublanes with pure VPU adds (no XLU reduce; the
    # reshape lands exactly on (8,128) tile boundaries, so it is layout-free).
    o_ref[...] += jnp.sum(sq.reshape(ts // 8, 8, 128), axis=0)


def grayscale_mse_loss(x, y, *, tile_rows=512):
    """x, y: [B, C, H, W] (NCHW, matching the PyTorch module) -> scalar f32."""
    assert x.shape == y.shape
    B, C, H, W = x.shape
    hw = H * W

    # Lane-dense view [B, C, rows, 128].  Pad the flattened spatial axis only up
    # to a multiple of 1024 when strictly necessary; zero padding is exact for
    # this loss ((0-0)^2 = 0) and the divisor uses the true element count.
    hw_p = _round_up(hw, 8 * 128)
    xr = x.reshape(B, C, hw)
    yr = y.reshape(B, C, hw)
    if hw_p != hw:
        pad = ((0, 0), (0, 0), (0, hw_p - hw))
        xr = jnp.pad(xr, pad)
        yr = jnp.pad(yr, pad)
    rows = hw_p // 128                     # always a multiple of 8
    xr = xr.reshape(B, C, rows, 128)
    yr = yr.reshape(B, C, rows, 128)

    # Spatial tile: large to amortize per-step overhead, capped so the
    # double-buffered inputs stay well inside scoped VMEM (v7x: 64 MiB/TC).
    itemsize = jnp.dtype(x.dtype).itemsize
    bytes_per_row = C * 128 * itemsize
    ts_cap = max(8, ((24 << 20) // (4 * bytes_per_row)) // 8 * 8)
    ts = min(tile_rows, rows, ts_cap)      # all multiples of 8 -> ts is too
    n_s = (rows + ts - 1) // ts
    need_mask = (n_s * ts != rows)

    block_bytes = C * ts * 128 * itemsize
    vmem_limit = min(4 * block_bytes + (16 << 20), 48 << 20)

    out = pl.pallas_call(
        functools.partial(_grayscale_mse_kernel,
                          ts=ts, rows_valid=rows, need_mask=need_mask),
        out_shape=jax.ShapeDtypeStruct((B, 8, 128), jnp.float32),
        grid_spec=pltpu.PrefetchScalarGridSpec(
            num_scalar_prefetch=0,
            grid=(B, n_s),                 # batch (parallel), spatial (reduction)
            in_specs=[
                pl.BlockSpec((None, C, ts, 128), lambda b, s: (b, 0, s, 0)),
                pl.BlockSpec((None, C, ts, 128), lambda b, s: (b, 0, s, 0)),
            ],
            out_specs=pl.BlockSpec((None, 8, 128), lambda b, s: (b, 0, 0)),
        ),
        compiler_params=pltpu.CompilerParams(
            dimension_semantics=("parallel", "arbitrary"),
            vmem_limit_bytes=int(vmem_limit),
        ),
    )(xr, yr)

    # ((1/C) * sum_c)^2 == (1/C^2) * (sum_c)^2 ; divide by the true count B*H*W.
    return jnp.sum(out) * (1.0 / (C * C * B * hw))


if __name__ == "__main__":
    kx, ky = jax.random.split(jax.random.PRNGKey(0))
    x = jax.random.normal(kx, (2, 3, 16, 16), jnp.float32)   # NCHW like PyTorch
    y = jax.random.normal(ky, (2, 3, 16, 16), jnp.float32)

    loss_fn = jax.jit(grayscale_mse_loss)
    loss = jax.block_until_ready(loss_fn(x, y))

    # Plain-JAX reference of the same forward pass (correctness gate).
    ref = jnp.mean((jnp.mean(x, axis=1) - jnp.mean(y, axis=1)) ** 2)

    assert loss.shape == ()
    assert bool(jnp.isfinite(loss))
    assert abs(float(loss) - float(ref)) < 1e-5
    print("KERNEL_OK")
</pallas_src>

<mosaic_0001>
module attributes {stable_mosaic.version = 11 : i64} {
  func.func @_grayscale_mse_kernel(%arg0: i32, %arg1: i32, %arg2: memref<1x3x8x128xf32, #tpu.memory_space<vmem>>, %arg3: memref<1x3x8x128xf32, #tpu.memory_space<vmem>>, %arg4: memref<1x8x128xf32, #tpu.memory_space<vmem>>) attributes {dimension_semantics = [#tpu.dimension_semantics<parallel>, #tpu.dimension_semantics<arbitrary>], iteration_bounds = array<i64: 2, 1>, scalar_prefetch = 0 : i64, scratch_operands = 0 : i64, tpu.core_type = #tpu.core_type<tc>, window_params = [{transform_indices = @transform_0, window_bounds = array<i64: 1, 3, 8, 128>}, {transform_indices = @transform_1, window_bounds = array<i64: 1, 3, 8, 128>}, {transform_indices = @transform_2, window_bounds = array<i64: 1, 8, 128>}]} {
    %c0_i32 = arith.constant 0 : i32
    %0 = arith.cmpi eq, %arg1, %c0_i32 : i32
    %1 = arith.extui %0 : i1 to i32
    %c0_i32_0 = arith.constant 0 : i32
    %2 = arith.cmpi ne, %1, %c0_i32_0 : i32
    scf.if %2 {
      %cst_15 = arith.constant 0.000000e+00 : f32
      %18 = vector.broadcast %cst_15 : f32 to vector<8x128xf32>
      %c0_16 = arith.constant 0 : index
      %c0_17 = arith.constant 0 : index
      %c0_18 = arith.constant 0 : index
      %19 = vector.load %arg4[%c0_16, %c0_17, %c0_18] : memref<1x8x128xf32, #tpu.memory_space<vmem>>, vector<1x8x128xf32>
      %20 = vector.shape_cast %19 : vector<1x8x128xf32> to vector<8x128xf32>
      %21 = vector.shape_cast %18 : vector<8x128xf32> to vector<1x8x128xf32>
      tpu.vector_store %arg4[%c0_16, %c0_17, %c0_18], %21 {strides = array<i32>} : memref<1x8x128xf32, #tpu.memory_space<vmem>>, vector<1x8x128xf32>,
    } else {
    }
    %c0 = arith.constant 0 : index
    %c0_1 = arith.constant 0 : index
    %c0_2 = arith.constant 0 : index
    %c0_3 = arith.constant 0 : index
    %3 = vector.load %arg2[%c0, %c0_1, %c0_2, %c0_3] : memref<1x3x8x128xf32, #tpu.memory_space<vmem>>, vector<1x3x8x128xf32>
    %4 = vector.shape_cast %3 : vector<1x3x8x128xf32> to vector<3x8x128xf32>
    %c0_4 = arith.constant 0 : index
    %c0_5 = arith.constant 0 : index
    %c0_6 = arith.constant 0 : index
    %c0_7 = arith.constant 0 : index
    %5 = vector.load %arg3[%c0_4, %c0_5, %c0_6, %c0_7] : memref<1x3x8x128xf32, #tpu.memory_space<vmem>>, vector<1x3x8x128xf32>
    %6 = vector.shape_cast %5 : vector<1x3x8x128xf32> to vector<3x8x128xf32>
    %7 = arith.subf %4, %6 : vector<3x8x128xf32>
    %cst = arith.constant dense<0.000000e+00> : vector<8x128xf32>
    %8 = vector.multi_reduction <add>, %7, %cst [0] : vector<3x8x128xf32> to vector<8x128xf32>
    %9 = arith.mulf %8, %8 : vector<8x128xf32>
    %c0_8 = arith.constant 0 : index
    %c0_9 = arith.constant 0 : index
    %c0_10 = arith.constant 0 : index
    %10 = vector.load %arg4[%c0_8, %c0_9, %c0_10] : memref<1x8x128xf32, #tpu.memory_space<vmem>>, vector<1x8x128xf32>
    %11 = vector.shape_cast %10 : vector<1x8x128xf32> to vector<8x128xf32>
    %12 = vector.shape_cast %9 : vector<8x128xf32> to vector<1x8x128xf32>
    %cst_11 = arith.constant dense<0.000000e+00> : vector<8x128xf32>
    %13 = vector.multi_reduction <add>, %12, %cst_11 [0] : vector<1x8x128xf32> to vector<8x128xf32>
    %14 = arith.addf %11, %13 : vector<8x128xf32>
    %c0_12 = arith.constant 0 : index
    %c0_13 = arith.constant 0 : index
    %c0_14 = arith.constant 0 : index
    %15 = vector.load %arg4[%c0_12, %c0_13, %c0_14] : memref<1x8x128xf32, #tpu.memory_space<vmem>>, vector<1x8x128xf32>
    %16 = vector.shape_cast %15 : vector<1x8x128xf32> to vector<8x128xf32>
    %17 = vector.shape_cast %14 : vector<8x128xf32> to vector<1x8x128xf32>
    tpu.vector_store %arg4[%c0_12, %c0_13, %c0_14], %17 {strides = array<i32>} : memref<1x8x128xf32, #tpu.memory_space<vmem>>, vector<1x8x128xf32>,
    return
  }
  func.func @transform_0(%arg0: i32, %arg1: i32) -> (i32, i32, i32, i32) {
    %c0_i32 = arith.constant 0 : i32
    %c0_i32_0 = arith.constant 0 : i32
    %c0_i32_1 = arith.constant 0 : i32
    return %arg0, %c0_i32, %arg1, %c0_i32_0 : i32, i32, i32, i32
  }
  func.func @transform_1(%arg0: i32, %arg1: i32) -> (i32, i32, i32, i32) {
    %c0_i32 = arith.constant 0 : i32
    %c0_i32_0 = arith.constant 0 : i32
    %c0_i32_1 = arith.constant 0 : i32
    return %arg0, %c0_i32, %arg1, %c0_i32_0 : i32, i32, i32, i32
  }
  func.func @transform_2(%arg0: i32, %arg1: i32) -> (i32, i32, i32) {
    %c0_i32 = arith.constant 0 : i32
    %c0_i32_0 = arith.constant 0 : i32
    %c0_i32_1 = arith.constant 0 : i32
    return %arg0, %c0_i32, %c0_i32_0 : i32, i32, i32
  }
}

</mosaic_0001>

<bundles_post_ra>
// kernel: grayscale_mse_loss.1
= control target key start
LH: loop header
LB: loop body
LE: loop exit
PB: predicated region body
PF: predicated region fallthrough
CT: control target
= control target key end

     0   :  { %s377_s9 = smov 0   ;;  %s379_s10 = smov 0   ;;  %s410_s0 = inlined_call_operand.vmem [shape: f32[2,3,8,128], index: 0, kind: input, shape index: {}]   ;;  %s411_s1 = inlined_call_operand.vmem [shape: f32[2,3,8,128], index: 1, kind: input, shape index: {}]   ;;  %s412_s2 = inlined_call_operand.vmem [shape: f32[2,8,128], index: 2, kind: output, shape index: {}]  }
   0x1   :  { %s381_s11 = smov 0  }
   0x2 LB: > { %s24_s12 = sadd.s32 1, %s356_s10  ;;  %p306_p0 = scmp.ge.s32.totalorder %s360_s11, 1  ;;  %s360_s11 = sphi %s381_s11, %s12_s11   ;;  %s356_s10 = sphi %s379_s10, %s414_s10   ;;  %s352_s9 = sphi %s377_s9, %s413_s9  }
   0x3   : > { %p26_p1 = scmp.ge.s32.totalorder %s24_s12, 2  ;;  %p144_p2 = scmp.lt.s32.totalorder %s360_s11, 3 }
   0x5   : > { %s416_s12 = smov (%p26_p1, %s24_s12), 0  ;;  %p145_p3 = pnand %p306_p0, %p144_p2 }
   0x6   : > { %p176_p4 = scmp.lt.s32.totalorder (!%p145_p3), %s352_s9, 1 }
   0x7   : > { %148 = sbr.rel (%p145_p3) target bundleno = 29 (0x1d), region = 28 }
   0xe   : > { %s418_s9 = smov (!%p176_p4, %s352_s9), 1 }
   0xf   : > { %s312_s13 = smul.u32 24, %s418_s9  ;;  %s309_s20 = sshll.u32 %s418_s9, 3 }
  0x10   : > { %s195_s23 = scalar_lea.vmem %s412_s2, %s309_s20 }
  0x11   : > { %s183_s16 = scalar_lea.vmem %s410_s0, %s312_s13  ;;  %s191_s19 = scalar_lea.vmem %s411_s1, %s312_s13 }
  0x12   : > { %v201_v0 = vld [vmem:[%s183_s16] sm:$0xff]  ;;  %v202_v1 = vld [vmem:[%s183_s16 + $0x8] sm:$0xff]  ;;  %v203_v4 = vld [vmem:[%s183_s16 + $0x10] sm:$0xff] }
  0x13   : > { %v204_v2 = vld [vmem:[%s191_s19] sm:$0xff]  ;;  %v205_v3 = vld [vmem:[%s191_s19 + $0x8] sm:$0xff]  ;;  %v206_v5 = vld [vmem:[%s191_s19 + $0x10] sm:$0xff] }
  0x14   : > { %v207_v6 = vsub.f32 %v201_v0, %v204_v2  ;;  %v208_v7 = vsub.f32 %v202_v1, %v205_v3  ;;  %v209_v8 = vsub.f32 %v203_v4, %v206_v5 }
  0x16   : > { %v210_v9 = vadd.f32 %v208_v7, %v207_v6 }
  0x18   : > { %v211_v10 = vadd.f32 %v210_v9, %v209_v8 }
  0x1a   : > { %v212_v11 = vmul.f32 %v211_v10, %v211_v10 }
  0x1c   : > { %216 = vst [vmem:[%s195_s23] sm:$0xff] %v212_v11 }
  0x1d PF: > { %s12_s11 = sadd.s32 1, %s360_s11   ;;  %s413_s9 = smov %s356_s10 }
  0x1e   : > { %p9_p5 = scmp.ge.s32.totalorder %s12_s11, 4   ;;  %s414_s10 = smov %s416_s12 }
  0x20   :  { %11 = sbr.rel (!%p9_p5) target bundleno = 2 (0x2), region = 65 }

</bundles_post_ra>
